<compile_context>
chip_gen: v6e
topology: v6e:2x2x1
jax: 0.10.0
libtpu: 0.0.40
codegen_flags: <defaults>
</compile_context>

<pallas_src>
import functools
import numpy as np
import jax
import jax.numpy as jnp
from jax import lax
from jax.experimental import pallas as pl
from jax.experimental.pallas import tpu as pltpu


# ----------------------------------------------------------------------------
# Knot construction (matches BSL.knots_distribution + sklearn SplineTransformer
# knot extension for non-periodic extrapolation).
# ----------------------------------------------------------------------------
def make_extended_knots(degree: int, num_knots: int) -> np.ndarray:
    n_mid = num_knots - 2 * degree - 2
    base = np.concatenate(
        [
            np.linspace(-0.002, -0.001, degree),
            np.linspace(0.0, 1.0, n_mid),
            np.linspace(1.001, 1.002, degree),
        ]
    )
    dist_min = base[1] - base[0]
    dist_max = base[-1] - base[-2]
    ext = np.r_[
        np.linspace(base[0] - degree * dist_min, base[0] - dist_min, degree),
        base,
        np.linspace(base[-1] + dist_max, base[-1] + degree * dist_max, degree),
    ]
    return ext  # length = (num_knots - 2) + 2*degree ; n_splines = num_knots (degree=3)


def _round_up(a: int, m: int) -> int:
    return ((a + m - 1) // m) * m


# ----------------------------------------------------------------------------
# Pallas kernel
# ----------------------------------------------------------------------------
def _bspline_kernel(x_ref, cp_ref, bias_ref, o_ref, *, knots, degree, n_splines,
                    sub_rows):
    t = knots
    n_t = len(t)
    assert n_t - degree - 1 == n_splines

    # Static pruning. NormLayer guarantees xn in [0, 1]: xn >= 0 exactly, and xn <= 1
    # up to one ulp (the per-row reciprocal-multiply), which still lands inside the
    # rightmost kept interval because the first knot above 1.0 is 1.001. Degree-0
    # intervals entirely outside [0, 1] are identically zero, and so is every higher
    # basis built only from them -> drop them at trace time.
    active0 = [j for j in range(n_t - 1) if (t[j] <= 1.0) and (t[j + 1] > 0.0)]

    TB = x_ref.shape[0]
    SUB = sub_rows
    assert TB % SUB == 0
    num_sub = TB // SUB

    bias_v = bias_ref[...]                                   # (1, N), loop-invariant

    def eval_chunk(xn):
        # ---- degree-0 indicators: one compare per surviving knot,
        #      indicator = ge[j] & ~ge[j+1], bool -> f32 directly ----
        need_ge = sorted(set(active0) | {j + 1 for j in active0})
        ge = {j: xn >= t[j] for j in need_ge}
        b = {j: (ge[j] & jnp.logical_not(ge[j + 1])).astype(jnp.float32)
             for j in active0}

        acc = None
        for k in range(1, degree + 1):
            last = (k == degree)
            wcache = {}

            def w(i, _k=k, _c=wcache):
                # Shared Cox-de Boor weight, reciprocal pre-folded as a Python float:
                #   w_i = (xn - t[i]) / (t[i+k] - t[i]);  term2 of basis i-1 is (1 - w_i).
                if i not in _c:
                    _c[i] = (xn - t[i]) * (1.0 / (t[i + _k] - t[i]))
                return _c[i]

            nb = {}
            for i in range(n_t - k - 1):
                term = None
                if (i in b) and (t[i + k] - t[i]) != 0.0:
                    term = w(i) * b[i]
                if ((i + 1) in b) and (t[i + k + 1] - t[i + 1]) != 0.0:
                    t2 = (1.0 - w(i + 1)) * b[i + 1]
                    term = t2 if term is None else term + t2
                if term is None:
                    continue                                 # provably-zero basis
                if last:
                    # Fuse the final level into the control-point accumulation: each
                    # degree-3 basis dies immediately instead of being materialized.
                    contrib = term * cp_ref[i, :][None, :]
                    acc = contrib if acc is None else acc + contrib
                else:
                    nb[i] = term
            if not last:
                b = nb

        if acc is None:
            acc = jnp.zeros_like(xn)
        return acc + bias_v                                  # (SUB, N) + (1, N)

    def body(s, carry):
        row0 = pl.multiple_of(s * SUB, SUB)
        x = x_ref[pl.ds(row0, SUB), :].astype(jnp.float32)
        # NormLayer: per-row min-max normalization. Reciprocal only on the (SUB, 1)
        # row range (exact, not approx: boundary knot spans are ~1e-3 wide).
        xmin = jnp.min(x, axis=1, keepdims=True)
        xmax = jnp.max(x, axis=1, keepdims=True)
        inv = 1.0 / (xmax - xmin)
        xn = (x - xmin) * inv
        o_ref[pl.ds(row0, SUB), :] = eval_chunk(xn).astype(o_ref.dtype)
        return carry

    lax.fori_loop(0, num_sub, body, 0)


# ----------------------------------------------------------------------------
# Wrapper
# ----------------------------------------------------------------------------
def bspline_block(x, control_p, bias, *, degree, num_knots,
                  block_rows=512, sub_rows=16):
    """x: (batch, num_features) with num_features == num_neurons -> (batch, num_neurons)."""
    assert degree == 3, "torch broadcasting in BSL only lines up for degree == 3"
    B, N = x.shape
    K, Ncp = control_p.shape
    assert K == num_knots and Ncp == N

    knots = tuple(float(v) for v in make_extended_knots(degree, num_knots))

    # Batch tile: multiple of sub_rows, capped; feature axis is never tiled (per-row
    # min/max must see the whole row) and stays lane-dense.
    TB = _round_up(min(block_rows, _round_up(B, sub_rows)), sub_rows)
    B_pad = _round_up(B, TB)

    xf = x.astype(jnp.float32)
    if B_pad != B:
        # Replicate edge rows (not zeros) so padded rows never hit max==min -> NaN.
        xf = jnp.pad(xf, ((0, B_pad - B), (0, 0)), mode="edge")

    kernel = functools.partial(
        _bspline_kernel, knots=knots, degree=degree,
        n_splines=num_knots, sub_rows=sub_rows,
    )

    out = pl.pallas_call(
        kernel,
        out_shape=jax.ShapeDtypeStruct((B_pad, N), jnp.float32),
        grid=(B_pad // TB,),
        in_specs=[
            pl.BlockSpec((TB, N), lambda i: (i, 0)),     # x: tiled over batch
            pl.BlockSpec((K, N), lambda i: (0, 0)),      # control_p: resident
            pl.BlockSpec((1, N), lambda i: (0, 0)),      # bias: resident
        ],
        out_specs=pl.BlockSpec((TB, N), lambda i: (i, 0)),
        compiler_params=pltpu.CompilerParams(dimension_semantics=("parallel",)),
    )(xf, control_p.astype(jnp.float32), bias.reshape(1, N).astype(jnp.float32))

    # Dropout(p=0.0) is the identity.
    return out[:B]


# ----------------------------------------------------------------------------
# Pure-numpy reference (same math as the torch module for these shapes; no pruning)
# ----------------------------------------------------------------------------
def ref_forward(x, cp, bias, degree, num_knots):
    x = np.asarray(x, np.float32)
    cp = np.asarray(cp, np.float32)
    bias = np.asarray(bias, np.float32)
    t = make_extended_knots(degree, num_knots)
    xmin = x.min(axis=1, keepdims=True)
    xmax = x.max(axis=1, keepdims=True)
    xn = (x - xmin) / (xmax - xmin)
    basis = [((t[j] <= xn) & (xn < t[j + 1])).astype(np.float32) for j in range(len(t) - 1)]
    for k in range(1, degree + 1):
        nb = []
        for i in range(len(t) - k - 1):
            d1 = float(t[i + k] - t[i])
            d2 = float(t[i + k + 1] - t[i + 1])
            term = np.zeros_like(xn)
            if d1 != 0.0:
                term = term + (xn - float(t[i])) / d1 * basis[i]
            if d2 != 0.0:
                term = term + (float(t[i + k + 1]) - xn) / d2 * basis[i + 1]
            nb.append(term)
        basis = nb
    Bmat = np.stack(basis, axis=0)                            # (K, batch, N)
    out = (Bmat * cp[:, None, :]).sum(axis=0) + bias[None, :]
    return out  # Dropout(0.0) == identity


if __name__ == "__main__":
    degree = 3
    num_knots = 16
    num_neurons = 128      # == num_features (required by torch broadcasting)
    batch = 50             # exercises batch padding + the in-kernel sub-chunk loop

    key = jax.random.PRNGKey(0)
    kx, kc, kb = jax.random.split(key, 3)
    x = jax.random.normal(kx, (batch, num_neurons), dtype=jnp.float32)
    control_p = jax.random.normal(kc, (num_knots, num_neurons), dtype=jnp.float32)
    bias = jax.random.normal(kb, (num_neurons,), dtype=jnp.float32)

    fn = jax.jit(functools.partial(bspline_block, degree=degree, num_knots=num_knots))
    out = fn(x, control_p, bias)
    out = jax.block_until_ready(out)

    ref = ref_forward(np.asarray(x), np.asarray(control_p), np.asarray(bias),
                      degree, num_knots)
    np.testing.assert_allclose(np.asarray(out), ref, rtol=1e-4, atol=1e-4)

    print("KERNEL_OK")
</pallas_src>

<mosaic_0001>
module attributes {stable_mosaic.version = 11 : i64} {
  func.func @_bspline_kernel(%arg0: i32, %arg1: memref<64x128xf32, #tpu.memory_space<vmem>>, %arg2: memref<16x128xf32, #tpu.memory_space<vmem>>, %arg3: memref<1x128xf32, #tpu.memory_space<vmem>>, %arg4: memref<64x128xf32, #tpu.memory_space<vmem>>) attributes {dimension_semantics = [#tpu.dimension_semantics<parallel>], iteration_bounds = array<i64: 1>, scalar_prefetch = 0 : i64, scratch_operands = 0 : i64, tpu.core_type = #tpu.core_type<tc>, window_params = [{transform_indices = @transform_0, window_bounds = array<i64: 64, 128>}, {pipeline_mode = #tpu.pipeline_mode<synchronous>, transform_indices = @transform_1, window_bounds = array<i64: 16, 128>}, {pipeline_mode = #tpu.pipeline_mode<synchronous>, transform_indices = @transform_2, window_bounds = array<i64: 1, 128>}, {transform_indices = @transform_3, window_bounds = array<i64: 64, 128>}]} {
    %c0 = arith.constant 0 : index
    %c0_0 = arith.constant 0 : index
    %0 = vector.load %arg3[%c0, %c0_0] : memref<1x128xf32, #tpu.memory_space<vmem>>, vector<1x128xf32>
    %c0_i32 = arith.constant 0 : i32
    %c4_i32 = arith.constant 4 : i32
    %1 = arith.addi %c0_i32, %c4_i32 : i32
    %c1_i32 = arith.constant 1 : i32
    scf.for %arg5 = %c0_i32 to %1 step %c1_i32  : i32 {
      %c16_i32 = arith.constant 16 : i32
      %2 = arith.muli %arg5, %c16_i32 : i32
      %3 = tpu.assume_multiple %2, 16 : i32
      %4 = arith.index_cast %3 : i32 to index
      %c0_2 = arith.constant 0 : index
      %5 = vector.load %arg1[%4, %c0_2] : memref<64x128xf32, #tpu.memory_space<vmem>>, vector<16x128xf32>
      %cst = arith.constant dense<0x7F800000> : vector<16xf32>
      %6 = vector.multi_reduction <minimumf>, %5, %cst [1] : vector<16x128xf32> to vector<16xf32>
      %7 = vector.shape_cast %6 : vector<16xf32> to vector<16x1xf32>
      %cst_3 = arith.constant dense<0xFF800000> : vector<16xf32>
      %8 = vector.multi_reduction <maximumf>, %5, %cst_3 [1] : vector<16x128xf32> to vector<16xf32>
      %9 = vector.shape_cast %8 : vector<16xf32> to vector<16x1xf32>
      %10 = arith.subf %9, %7 : vector<16x1xf32>
      %cst_4 = arith.constant 1.000000e+00 : f32
      %11 = vector.broadcast %cst_4 : f32 to vector<16x1xf32>
      %12 = arith.divf %11, %10 : vector<16x1xf32>
      %13 = vector.broadcast %7 : vector<16x1xf32> to vector<16x128xf32>
      %14 = arith.subf %5, %13 : vector<16x128xf32>
      %15 = vector.broadcast %12 : vector<16x1xf32> to vector<16x128xf32>
      %16 = arith.mulf %14, %15 : vector<16x128xf32>
      %cst_5 = arith.constant 0.000000e+00 : f32
      %17 = vector.broadcast %cst_5 : f32 to vector<16x128xf32>
      %18 = arith.cmpf oge, %16, %17 : vector<16x128xf32>
      %cst_6 = arith.constant 0.142857149 : f32
      %19 = vector.broadcast %cst_6 : f32 to vector<16x128xf32>
      %20 = arith.cmpf oge, %16, %19 : vector<16x128xf32>
      %cst_7 = arith.constant 0.285714298 : f32
      %21 = vector.broadcast %cst_7 : f32 to vector<16x128xf32>
      %22 = arith.cmpf oge, %16, %21 : vector<16x128xf32>
      %cst_8 = arith.constant 0.428571433 : f32
      %23 = vector.broadcast %cst_8 : f32 to vector<16x128xf32>
      %24 = arith.cmpf oge, %16, %23 : vector<16x128xf32>
      %cst_9 = arith.constant 0.571428597 : f32
      %25 = vector.broadcast %cst_9 : f32 to vector<16x128xf32>
      %26 = arith.cmpf oge, %16, %25 : vector<16x128xf32>
      %cst_10 = arith.constant 0.714285731 : f32
      %27 = vector.broadcast %cst_10 : f32 to vector<16x128xf32>
      %28 = arith.cmpf oge, %16, %27 : vector<16x128xf32>
      %cst_11 = arith.constant 0.857142865 : f32
      %29 = vector.broadcast %cst_11 : f32 to vector<16x128xf32>
      %30 = arith.cmpf oge, %16, %29 : vector<16x128xf32>
      %cst_12 = arith.constant 1.000000e+00 : f32
      %31 = vector.broadcast %cst_12 : f32 to vector<16x128xf32>
      %32 = arith.cmpf oge, %16, %31 : vector<16x128xf32>
      %cst_13 = arith.constant 1.001000e+00 : f32
      %33 = vector.broadcast %cst_13 : f32 to vector<16x128xf32>
      %34 = arith.cmpf oge, %16, %33 : vector<16x128xf32>
      %cst_14 = arith.constant dense<true> : vector<16x128xi1>
      %35 = arith.xori %20, %cst_14 : vector<16x128xi1>
      %36 = arith.andi %18, %35 : vector<16x128xi1>
      %37 = arith.extui %36 : vector<16x128xi1> to vector<16x128xi32>
      %38 = arith.sitofp %37 : vector<16x128xi32> to vector<16x128xf32>
      %cst_15 = arith.constant dense<true> : vector<16x128xi1>
      %39 = arith.xori %22, %cst_15 : vector<16x128xi1>
      %40 = arith.andi %20, %39 : vector<16x128xi1>
      %41 = arith.extui %40 : vector<16x128xi1> to vector<16x128xi32>
      %42 = arith.sitofp %41 : vector<16x128xi32> to vector<16x128xf32>
      %cst_16 = arith.constant dense<true> : vector<16x128xi1>
      %43 = arith.xori %24, %cst_16 : vector<16x128xi1>
      %44 = arith.andi %22, %43 : vector<16x128xi1>
      %45 = arith.extui %44 : vector<16x128xi1> to vector<16x128xi32>
      %46 = arith.sitofp %45 : vector<16x128xi32> to vector<16x128xf32>
      %cst_17 = arith.constant dense<true> : vector<16x128xi1>
      %47 = arith.xori %26, %cst_17 : vector<16x128xi1>
      %48 = arith.andi %24, %47 : vector<16x128xi1>
      %49 = arith.extui %48 : vector<16x128xi1> to vector<16x128xi32>
      %50 = arith.sitofp %49 : vector<16x128xi32> to vector<16x128xf32>
      %cst_18 = arith.constant dense<true> : vector<16x128xi1>
      %51 = arith.xori %28, %cst_18 : vector<16x128xi1>
      %52 = arith.andi %26, %51 : vector<16x128xi1>
      %53 = arith.extui %52 : vector<16x128xi1> to vector<16x128xi32>
      %54 = arith.sitofp %53 : vector<16x128xi32> to vector<16x128xf32>
      %cst_19 = arith.constant dense<true> : vector<16x128xi1>
      %55 = arith.xori %30, %cst_19 : vector<16x128xi1>
      %56 = arith.andi %28, %55 : vector<16x128xi1>
      %57 = arith.extui %56 : vector<16x128xi1> to vector<16x128xi32>
      %58 = arith.sitofp %57 : vector<16x128xi32> to vector<16x128xf32>
      %cst_20 = arith.constant dense<true> : vector<16x128xi1>
      %59 = arith.xori %32, %cst_20 : vector<16x128xi1>
      %60 = arith.andi %30, %59 : vector<16x128xi1>
      %61 = arith.extui %60 : vector<16x128xi1> to vector<16x128xi32>
      %62 = arith.sitofp %61 : vector<16x128xi32> to vector<16x128xf32>
      %cst_21 = arith.constant dense<true> : vector<16x128xi1>
      %63 = arith.xori %34, %cst_21 : vector<16x128xi1>
      %64 = arith.andi %32, %63 : vector<16x128xi1>
      %65 = arith.extui %64 : vector<16x128xi1> to vector<16x128xi32>
      %66 = arith.sitofp %65 : vector<16x128xi32> to vector<16x128xf32>
      %cst_22 = arith.constant 0.000000e+00 : f32
      %67 = vector.broadcast %cst_22 : f32 to vector<16x128xf32>
      %68 = arith.subf %16, %67 : vector<16x128xf32>
      %cst_23 = arith.constant 7.000000e+00 : f32
      %69 = vector.broadcast %cst_23 : f32 to vector<16x128xf32>
      %70 = arith.mulf %68, %69 : vector<16x128xf32>
      %cst_24 = arith.constant 1.000000e+00 : f32
      %71 = vector.broadcast %cst_24 : f32 to vector<16x128xf32>
      %72 = arith.subf %71, %70 : vector<16x128xf32>
      %73 = arith.mulf %72, %38 : vector<16x128xf32>
      %74 = arith.mulf %70, %38 : vector<16x128xf32>
      %cst_25 = arith.constant 0.142857149 : f32
      %75 = vector.broadcast %cst_25 : f32 to vector<16x128xf32>
      %76 = arith.subf %16, %75 : vector<16x128xf32>
      %cst_26 = arith.constant 7.000000e+00 : f32
      %77 = vector.broadcast %cst_26 : f32 to vector<16x128xf32>
      %78 = arith.mulf %76, %77 : vector<16x128xf32>
      %cst_27 = arith.constant 1.000000e+00 : f32
      %79 = vector.broadcast %cst_27 : f32 to vector<16x128xf32>
      %80 = arith.subf %79, %78 : vector<16x128xf32>
      %81 = arith.mulf %80, %42 : vector<16x128xf32>
      %82 = arith.addf %74, %81 : vector<16x128xf32>
      %83 = arith.mulf %78, %42 : vector<16x128xf32>
      %cst_28 = arith.constant 0.285714298 : f32
      %84 = vector.broadcast %cst_28 : f32 to vector<16x128xf32>
      %85 = arith.subf %16, %84 : vector<16x128xf32>
      %cst_29 = arith.constant 7.000000e+00 : f32
      %86 = vector.broadcast %cst_29 : f32 to vector<16x128xf32>
      %87 = arith.mulf %85, %86 : vector<16x128xf32>
      %cst_30 = arith.constant 1.000000e+00 : f32
      %88 = vector.broadcast %cst_30 : f32 to vector<16x128xf32>
      %89 = arith.subf %88, %87 : vector<16x128xf32>
      %90 = arith.mulf %89, %46 : vector<16x128xf32>
      %91 = arith.addf %83, %90 : vector<16x128xf32>
      %92 = arith.mulf %87, %46 : vector<16x128xf32>
      %cst_31 = arith.constant 0.428571433 : f32
      %93 = vector.broadcast %cst_31 : f32 to vector<16x128xf32>
      %94 = arith.subf %16, %93 : vector<16x128xf32>
      %cst_32 = arith.constant 7.000000e+00 : f32
      %95 = vector.broadcast %cst_32 : f32 to vector<16x128xf32>
      %96 = arith.mulf %94, %95 : vector<16x128xf32>
      %cst_33 = arith.constant 1.000000e+00 : f32
      %97 = vector.broadcast %cst_33 : f32 to vector<16x128xf32>
      %98 = arith.subf %97, %96 : vector<16x128xf32>
      %99 = arith.mulf %98, %50 : vector<16x128xf32>
      %100 = arith.addf %92, %99 : vector<16x128xf32>
      %101 = arith.mulf %96, %50 : vector<16x128xf32>
      %cst_34 = arith.constant 0.571428597 : f32
      %102 = vector.broadcast %cst_34 : f32 to vector<16x128xf32>
      %103 = arith.subf %16, %102 : vector<16x128xf32>
      %cst_35 = arith.constant 7.000000e+00 : f32
      %104 = vector.broadcast %cst_35 : f32 to vector<16x128xf32>
      %105 = arith.mulf %103, %104 : vector<16x128xf32>
      %cst_36 = arith.constant 1.000000e+00 : f32
      %106 = vector.broadcast %cst_36 : f32 to vector<16x128xf32>
      %107 = arith.subf %106, %105 : vector<16x128xf32>
      %108 = arith.mulf %107, %54 : vector<16x128xf32>
      %109 = arith.addf %101, %108 : vector<16x128xf32>
      %110 = arith.mulf %105, %54 : vector<16x128xf32>
      %cst_37 = arith.constant 0.714285731 : f32
      %111 = vector.broadcast %cst_37 : f32 to vector<16x128xf32>
      %112 = arith.subf %16, %111 : vector<16x128xf32>
      %cst_38 = arith.constant 7.000000e+00 : f32
      %113 = vector.broadcast %cst_38 : f32 to vector<16x128xf32>
      %114 = arith.mulf %112, %113 : vector<16x128xf32>
      %cst_39 = arith.constant 1.000000e+00 : f32
      %115 = vector.broadcast %cst_39 : f32 to vector<16x128xf32>
      %116 = arith.subf %115, %114 : vector<16x128xf32>
      %117 = arith.mulf %116, %58 : vector<16x128xf32>
      %118 = arith.addf %110, %117 : vector<16x128xf32>
      %119 = arith.mulf %114, %58 : vector<16x128xf32>
      %cst_40 = arith.constant 0.857142865 : f32
      %120 = vector.broadcast %cst_40 : f32 to vector<16x128xf32>
      %121 = arith.subf %16, %120 : vector<16x128xf32>
      %cst_41 = arith.constant 7.000000e+00 : f32
      %122 = vector.broadcast %cst_41 : f32 to vector<16x128xf32>
      %123 = arith.mulf %121, %122 : vector<16x128xf32>
      %cst_42 = arith.constant 1.000000e+00 : f32
      %124 = vector.broadcast %cst_42 : f32 to vector<16x128xf32>
      %125 = arith.subf %124, %123 : vector<16x128xf32>
      %126 = arith.mulf %125, %62 : vector<16x128xf32>
      %127 = arith.addf %119, %126 : vector<16x128xf32>
      %128 = arith.mulf %123, %62 : vector<16x128xf32>
      %cst_43 = arith.constant 1.000000e+00 : f32
      %129 = vector.broadcast %cst_43 : f32 to vector<16x128xf32>
      %130 = arith.subf %16, %129 : vector<16x128xf32>
      %cst_44 = arith.constant 1.000000e+03 : f32
      %131 = vector.broadcast %cst_44 : f32 to vector<16x128xf32>
      %132 = arith.mulf %130, %131 : vector<16x128xf32>
      %cst_45 = arith.constant 1.000000e+00 : f32
      %133 = vector.broadcast %cst_45 : f32 to vector<16x128xf32>
      %134 = arith.subf %133, %132 : vector<16x128xf32>
      %135 = arith.mulf %134, %66 : vector<16x128xf32>
      %136 = arith.addf %128, %135 : vector<16x128xf32>
      %137 = arith.mulf %132, %66 : vector<16x128xf32>
      %cst_46 = arith.constant -1.000000e-03 : f32
      %138 = vector.broadcast %cst_46 : f32 to vector<16x128xf32>
      %139 = arith.subf %16, %138 : vector<16x128xf32>
      %cst_47 = arith.constant 6.95134067 : f32
      %140 = vector.broadcast %cst_47 : f32 to vector<16x128xf32>
      %141 = arith.mulf %139, %140 : vector<16x128xf32>
      %cst_48 = arith.constant 1.000000e+00 : f32
      %142 = vector.broadcast %cst_48 : f32 to vector<16x128xf32>
      %143 = arith.subf %142, %141 : vector<16x128xf32>
      %144 = arith.mulf %143, %73 : vector<16x128xf32>
      %145 = arith.mulf %141, %73 : vector<16x128xf32>
      %cst_49 = arith.constant 0.000000e+00 : f32
      %146 = vector.broadcast %cst_49 : f32 to vector<16x128xf32>
      %147 = arith.subf %16, %146 : vector<16x128xf32>
      %cst_50 = arith.constant 3.500000e+00 : f32
      %148 = vector.broadcast %cst_50 : f32 to vector<16x128xf32>
      %149 = arith.mulf %147, %148 : vector<16x128xf32>
      %cst_51 = arith.constant 1.000000e+00 : f32
      %150 = vector.broadcast %cst_51 : f32 to vector<16x128xf32>
      %151 = arith.subf %150, %149 : vector<16x128xf32>
      %152 = arith.mulf %151, %82 : vector<16x128xf32>
      %153 = arith.addf %145, %152 : vector<16x128xf32>
      %154 = arith.mulf %149, %82 : vector<16x128xf32>
      %cst_52 = arith.constant 0.142857149 : f32
      %155 = vector.broadcast %cst_52 : f32 to vector<16x128xf32>
      %156 = arith.subf %16, %155 : vector<16x128xf32>
      %cst_53 = arith.constant 3.500000e+00 : f32
      %157 = vector.broadcast %cst_53 : f32 to vector<16x128xf32>
      %158 = arith.mulf %156, %157 : vector<16x128xf32>
      %cst_54 = arith.constant 1.000000e+00 : f32
      %159 = vector.broadcast %cst_54 : f32 to vector<16x128xf32>
      %160 = arith.subf %159, %158 : vector<16x128xf32>
      %161 = arith.mulf %160, %91 : vector<16x128xf32>
      %162 = arith.addf %154, %161 : vector<16x128xf32>
      %163 = arith.mulf %158, %91 : vector<16x128xf32>
      %cst_55 = arith.constant 0.285714298 : f32
      %164 = vector.broadcast %cst_55 : f32 to vector<16x128xf32>
      %165 = arith.subf %16, %164 : vector<16x128xf32>
      %cst_56 = arith.constant 3.500000e+00 : f32
      %166 = vector.broadcast %cst_56 : f32 to vector<16x128xf32>
      %167 = arith.mulf %165, %166 : vector<16x128xf32>
      %cst_57 = arith.constant 1.000000e+00 : f32
      %168 = vector.broadcast %cst_57 : f32 to vector<16x128xf32>
      %169 = arith.subf %168, %167 : vector<16x128xf32>
      %170 = arith.mulf %169, %100 : vector<16x128xf32>
      %171 = arith.addf %163, %170 : vector<16x128xf32>
      %172 = arith.mulf %167, %100 : vector<16x128xf32>
      %cst_58 = arith.constant 0.428571433 : f32
      %173 = vector.broadcast %cst_58 : f32 to vector<16x128xf32>
      %174 = arith.subf %16, %173 : vector<16x128xf32>
      %cst_59 = arith.constant 3.500000e+00 : f32
      %175 = vector.broadcast %cst_59 : f32 to vector<16x128xf32>
      %176 = arith.mulf %174, %175 : vector<16x128xf32>
      %cst_60 = arith.constant 1.000000e+00 : f32
      %177 = vector.broadcast %cst_60 : f32 to vector<16x128xf32>
      %178 = arith.subf %177, %176 : vector<16x128xf32>
      %179 = arith.mulf %178, %109 : vector<16x128xf32>
      %180 = arith.addf %172, %179 : vector<16x128xf32>
      %181 = arith.mulf %176, %109 : vector<16x128xf32>
      %cst_61 = arith.constant 0.571428597 : f32
      %182 = vector.broadcast %cst_61 : f32 to vector<16x128xf32>
      %183 = arith.subf %16, %182 : vector<16x128xf32>
      %cst_62 = arith.constant 3.500000e+00 : f32
      %184 = vector.broadcast %cst_62 : f32 to vector<16x128xf32>
      %185 = arith.mulf %183, %184 : vector<16x128xf32>
      %cst_63 = arith.constant 1.000000e+00 : f32
      %186 = vector.broadcast %cst_63 : f32 to vector<16x128xf32>
      %187 = arith.subf %186, %185 : vector<16x128xf32>
      %188 = arith.mulf %187, %118 : vector<16x128xf32>
      %189 = arith.addf %181, %188 : vector<16x128xf32>
      %190 = arith.mulf %185, %118 : vector<16x128xf32>
      %cst_64 = arith.constant 0.714285731 : f32
      %191 = vector.broadcast %cst_64 : f32 to vector<16x128xf32>
      %192 = arith.subf %16, %191 : vector<16x128xf32>
      %cst_65 = arith.constant 3.500000e+00 : f32
      %193 = vector.broadcast %cst_65 : f32 to vector<16x128xf32>
      %194 = arith.mulf %192, %193 : vector<16x128xf32>
      %cst_66 = arith.constant 1.000000e+00 : f32
      %195 = vector.broadcast %cst_66 : f32 to vector<16x128xf32>
      %196 = arith.subf %195, %194 : vector<16x128xf32>
      %197 = arith.mulf %196, %127 : vector<16x128xf32>
      %198 = arith.addf %190, %197 : vector<16x128xf32>
      %199 = arith.mulf %194, %127 : vector<16x128xf32>
      %cst_67 = arith.constant 0.857142865 : f32
      %200 = vector.broadcast %cst_67 : f32 to vector<16x128xf32>
      %201 = arith.subf %16, %200 : vector<16x128xf32>
      %cst_68 = arith.constant 6.95134067 : f32
      %202 = vector.broadcast %cst_68 : f32 to vector<16x128xf32>
      %203 = arith.mulf %201, %202 : vector<16x128xf32>
      %cst_69 = arith.constant 1.000000e+00 : f32
      %204 = vector.broadcast %cst_69 : f32 to vector<16x128xf32>
      %205 = arith.subf %204, %203 : vector<16x128xf32>
      %206 = arith.mulf %205, %136 : vector<16x128xf32>
      %207 = arith.addf %199, %206 : vector<16x128xf32>
      %208 = arith.mulf %203, %136 : vector<16x128xf32>
      %cst_70 = arith.constant 1.000000e+00 : f32
      %209 = vector.broadcast %cst_70 : f32 to vector<16x128xf32>
      %210 = arith.subf %16, %209 : vector<16x128xf32>
      %cst_71 = arith.constant 666.666687 : f32
      %211 = vector.broadcast %cst_71 : f32 to vector<16x128xf32>
      %212 = arith.mulf %210, %211 : vector<16x128xf32>
      %cst_72 = arith.constant 1.000000e+00 : f32
      %213 = vector.broadcast %cst_72 : f32 to vector<16x128xf32>
      %214 = arith.subf %213, %212 : vector<16x128xf32>
      %215 = arith.mulf %214, %137 : vector<16x128xf32>
      %216 = arith.addf %208, %215 : vector<16x128xf32>
      %217 = arith.mulf %212, %137 : vector<16x128xf32>
      %cst_73 = arith.constant -1.500000e-03 : f32
      %218 = vector.broadcast %cst_73 : f32 to vector<16x128xf32>
      %219 = arith.subf %16, %218 : vector<16x128xf32>
      %cst_74 = arith.constant 6.92726374 : f32
      %220 = vector.broadcast %cst_74 : f32 to vector<16x128xf32>
      %221 = arith.mulf %219, %220 : vector<16x128xf32>
      %cst_75 = arith.constant 1.000000e+00 : f32
      %222 = vector.broadcast %cst_75 : f32 to vector<16x128xf32>
      %223 = arith.subf %222, %221 : vector<16x128xf32>
      %224 = arith.mulf %223, %144 : vector<16x128xf32>
      %c3 = arith.constant 3 : index
      %c0_76 = arith.constant 0 : index
      %225 = vector.load %arg2[%c3, %c0_76] : memref<16x128xf32, #tpu.memory_space<vmem>>, vector<1x128xf32>
      %226 = vector.shape_cast %225 : vector<1x128xf32> to vector<128xf32>
      %227 = vector.shape_cast %226 : vector<128xf32> to vector<1x128xf32>
      %228 = vector.broadcast %227 : vector<1x128xf32> to vector<16x128xf32>
      %229 = arith.mulf %224, %228 : vector<16x128xf32>
      %230 = arith.mulf %221, %144 : vector<16x128xf32>
      %cst_77 = arith.constant -1.000000e-03 : f32
      %231 = vector.broadcast %cst_77 : f32 to vector<16x128xf32>
      %232 = arith.subf %16, %231 : vector<16x128xf32>
      %cst_78 = arith.constant 3.48779273 : f32
      %233 = vector.broadcast %cst_78 : f32 to vector<16x128xf32>
      %234 = arith.mulf %232, %233 : vector<16x128xf32>
      %cst_79 = arith.constant 1.000000e+00 : f32
      %235 = vector.broadcast %cst_79 : f32 to vector<16x128xf32>
      %236 = arith.subf %235, %234 : vector<16x128xf32>
      %237 = arith.mulf %236, %153 : vector<16x128xf32>
      %238 = arith.addf %230, %237 : vector<16x128xf32>
      %c4 = arith.constant 4 : index
      %c0_80 = arith.constant 0 : index
      %239 = vector.load %arg2[%c4, %c0_80] : memref<16x128xf32, #tpu.memory_space<vmem>>, vector<1x128xf32>
      %240 = vector.shape_cast %239 : vector<1x128xf32> to vector<128xf32>
      %241 = vector.shape_cast %240 : vector<128xf32> to vector<1x128xf32>
      %242 = vector.broadcast %241 : vector<1x128xf32> to vector<16x128xf32>
      %243 = arith.mulf %238, %242 : vector<16x128xf32>
      %244 = arith.addf %229, %243 : vector<16x128xf32>
      %245 = arith.mulf %234, %153 : vector<16x128xf32>
      %cst_81 = arith.constant 0.000000e+00 : f32
      %246 = vector.broadcast %cst_81 : f32 to vector<16x128xf32>
      %247 = arith.subf %16, %246 : vector<16x128xf32>
      %cst_82 = arith.constant 2.33333325 : f32
      %248 = vector.broadcast %cst_82 : f32 to vector<16x128xf32>
      %249 = arith.mulf %247, %248 : vector<16x128xf32>
      %cst_83 = arith.constant 1.000000e+00 : f32
      %250 = vector.broadcast %cst_83 : f32 to vector<16x128xf32>
      %251 = arith.subf %250, %249 : vector<16x128xf32>
      %252 = arith.mulf %251, %162 : vector<16x128xf32>
      %253 = arith.addf %245, %252 : vector<16x128xf32>
      %c5 = arith.constant 5 : index
      %c0_84 = arith.constant 0 : index
      %254 = vector.load %arg2[%c5, %c0_84] : memref<16x128xf32, #tpu.memory_space<vmem>>, vector<1x128xf32>
      %255 = vector.shape_cast %254 : vector<1x128xf32> to vector<128xf32>
      %256 = vector.shape_cast %255 : vector<128xf32> to vector<1x128xf32>
      %257 = vector.broadcast %256 : vector<1x128xf32> to vector<16x128xf32>
      %258 = arith.mulf %253, %257 : vector<16x128xf32>
      %259 = arith.addf %244, %258 : vector<16x128xf32>
      %260 = arith.mulf %249, %162 : vector<16x128xf32>
      %cst_85 = arith.constant 0.142857149 : f32
      %261 = vector.broadcast %cst_85 : f32 to vector<16x128xf32>
      %262 = arith.subf %16, %261 : vector<16x128xf32>
      %cst_86 = arith.constant 2.33333325 : f32
      %263 = vector.broadcast %cst_86 : f32 to vector<16x128xf32>
      %264 = arith.mulf %262, %263 : vector<16x128xf32>
      %cst_87 = arith.constant 1.000000e+00 : f32
      %265 = vector.broadcast %cst_87 : f32 to vector<16x128xf32>
      %266 = arith.subf %265, %264 : vector<16x128xf32>
      %267 = arith.mulf %266, %171 : vector<16x128xf32>
      %268 = arith.addf %260, %267 : vector<16x128xf32>
      %c6 = arith.constant 6 : index
      %c0_88 = arith.constant 0 : index
      %269 = vector.load %arg2[%c6, %c0_88] : memref<16x128xf32, #tpu.memory_space<vmem>>, vector<1x128xf32>
      %270 = vector.shape_cast %269 : vector<1x128xf32> to vector<128xf32>
      %271 = vector.shape_cast %270 : vector<128xf32> to vector<1x128xf32>
      %272 = vector.broadcast %271 : vector<1x128xf32> to vector<16x128xf32>
      %273 = arith.mulf %268, %272 : vector<16x128xf32>
      %274 = arith.addf %259, %273 : vector<16x128xf32>
      %275 = arith.mulf %264, %171 : vector<16x128xf32>
      %cst_89 = arith.constant 0.285714298 : f32
      %276 = vector.broadcast %cst_89 : f32 to vector<16x128xf32>
      %277 = arith.subf %16, %276 : vector<16x128xf32>
      %cst_90 = arith.constant 2.33333325 : f32
      %278 = vector.broadcast %cst_90 : f32 to vector<16x128xf32>
      %279 = arith.mulf %277, %278 : vector<16x128xf32>
      %cst_91 = arith.constant 1.000000e+00 : f32
      %280 = vector.broadcast %cst_91 : f32 to vector<16x128xf32>
      %281 = arith.subf %280, %279 : vector<16x128xf32>
      %282 = arith.mulf %281, %180 : vector<16x128xf32>
      %283 = arith.addf %275, %282 : vector<16x128xf32>
      %c7 = arith.constant 7 : index
      %c0_92 = arith.constant 0 : index
      %284 = vector.load %arg2[%c7, %c0_92] : memref<16x128xf32, #tpu.memory_space<vmem>>, vector<1x128xf32>
      %285 = vector.shape_cast %284 : vector<1x128xf32> to vector<128xf32>
      %286 = vector.shape_cast %285 : vector<128xf32> to vector<1x128xf32>
      %287 = vector.broadcast %286 : vector<1x128xf32> to vector<16x128xf32>
      %288 = arith.mulf %283, %287 : vector<16x128xf32>
      %289 = arith.addf %274, %288 : vector<16x128xf32>
      %290 = arith.mulf %279, %180 : vector<16x128xf32>
      %cst_93 = arith.constant 0.428571433 : f32
      %291 = vector.broadcast %cst_93 : f32 to vector<16x128xf32>
      %292 = arith.subf %16, %291 : vector<16x128xf32>
      %cst_94 = arith.constant 2.33333325 : f32
      %293 = vector.broadcast %cst_94 : f32 to vector<16x128xf32>
      %294 = arith.mulf %292, %293 : vector<16x128xf32>
      %cst_95 = arith.constant 1.000000e+00 : f32
      %295 = vector.broadcast %cst_95 : f32 to vector<16x128xf32>
      %296 = arith.subf %295, %294 : vector<16x128xf32>
      %297 = arith.mulf %296, %189 : vector<16x128xf32>
      %298 = arith.addf %290, %297 : vector<16x128xf32>
      %c8 = arith.constant 8 : index
      %c0_96 = arith.constant 0 : index
      %299 = vector.load %arg2[%c8, %c0_96] : memref<16x128xf32, #tpu.memory_space<vmem>>, vector<1x128xf32>
      %300 = vector.shape_cast %299 : vector<1x128xf32> to vector<128xf32>
      %301 = vector.shape_cast %300 : vector<128xf32> to vector<1x128xf32>
      %302 = vector.broadcast %301 : vector<1x128xf32> to vector<16x128xf32>
      %303 = arith.mulf %298, %302 : vector<16x128xf32>
      %304 = arith.addf %289, %303 : vector<16x128xf32>
      %305 = arith.mulf %294, %189 : vector<16x128xf32>
      %cst_97 = arith.constant 0.571428597 : f32
      %306 = vector.broadcast %cst_97 : f32 to vector<16x128xf32>
      %307 = arith.subf %16, %306 : vector<16x128xf32>
      %cst_98 = arith.constant 2.33333325 : f32
      %308 = vector.broadcast %cst_98 : f32 to vector<16x128xf32>
      %309 = arith.mulf %307, %308 : vector<16x128xf32>
      %cst_99 = arith.constant 1.000000e+00 : f32
      %310 = vector.broadcast %cst_99 : f32 to vector<16x128xf32>
      %311 = arith.subf %310, %309 : vector<16x128xf32>
      %312 = arith.mulf %311, %198 : vector<16x128xf32>
      %313 = arith.addf %305, %312 : vector<16x128xf32>
      %c9 = arith.constant 9 : index
      %c0_100 = arith.constant 0 : index
      %314 = vector.load %arg2[%c9, %c0_100] : memref<16x128xf32, #tpu.memory_space<vmem>>, vector<1x128xf32>
      %315 = vector.shape_cast %314 : vector<1x128xf32> to vector<128xf32>
      %316 = vector.shape_cast %315 : vector<128xf32> to vector<1x128xf32>
      %317 = vector.broadcast %316 : vector<1x128xf32> to vector<16x128xf32>
      %318 = arith.mulf %313, %317 : vector<16x128xf32>
      %319 = arith.addf %304, %318 : vector<16x128xf32>
      %320 = arith.mulf %309, %198 : vector<16x128xf32>
      %cst_101 = arith.constant 0.714285731 : f32
      %321 = vector.broadcast %cst_101 : f32 to vector<16x128xf32>
      %322 = arith.subf %16, %321 : vector<16x128xf32>
      %cst_102 = arith.constant 3.48779273 : f32
      %323 = vector.broadcast %cst_102 : f32 to vector<16x128xf32>
      %324 = arith.mulf %322, %323 : vector<16x128xf32>
      %cst_103 = arith.constant 1.000000e+00 : f32
      %325 = vector.broadcast %cst_103 : f32 to vector<16x128xf32>
      %326 = arith.subf %325, %324 : vector<16x128xf32>
      %327 = arith.mulf %326, %207 : vector<16x128xf32>
      %328 = arith.addf %320, %327 : vector<16x128xf32>
      %c10 = arith.constant 10 : index
      %c0_104 = arith.constant 0 : index
      %329 = vector.load %arg2[%c10, %c0_104] : memref<16x128xf32, #tpu.memory_space<vmem>>, vector<1x128xf32>
      %330 = vector.shape_cast %329 : vector<1x128xf32> to vector<128xf32>
      %331 = vector.shape_cast %330 : vector<128xf32> to vector<1x128xf32>
      %332 = vector.broadcast %331 : vector<1x128xf32> to vector<16x128xf32>
      %333 = arith.mulf %328, %332 : vector<16x128xf32>
      %334 = arith.addf %319, %333 : vector<16x128xf32>
      %335 = arith.mulf %324, %207 : vector<16x128xf32>
      %cst_105 = arith.constant 0.857142865 : f32
      %336 = vector.broadcast %cst_105 : f32 to vector<16x128xf32>
      %337 = arith.subf %16, %336 : vector<16x128xf32>
      %cst_106 = arith.constant 6.92726374 : f32
      %338 = vector.broadcast %cst_106 : f32 to vector<16x128xf32>
      %339 = arith.mulf %337, %338 : vector<16x128xf32>
      %cst_107 = arith.constant 1.000000e+00 : f32
      %340 = vector.broadcast %cst_107 : f32 to vector<16x128xf32>
      %341 = arith.subf %340, %339 : vector<16x128xf32>
      %342 = arith.mulf %341, %216 : vector<16x128xf32>
      %343 = arith.addf %335, %342 : vector<16x128xf32>
      %c11 = arith.constant 11 : index
      %c0_108 = arith.constant 0 : index
      %344 = vector.load %arg2[%c11, %c0_108] : memref<16x128xf32, #tpu.memory_space<vmem>>, vector<1x128xf32>
      %345 = vector.shape_cast %344 : vector<1x128xf32> to vector<128xf32>
      %346 = vector.shape_cast %345 : vector<128xf32> to vector<1x128xf32>
      %347 = vector.broadcast %346 : vector<1x128xf32> to vector<16x128xf32>
      %348 = arith.mulf %343, %347 : vector<16x128xf32>
      %349 = arith.addf %334, %348 : vector<16x128xf32>
      %350 = arith.mulf %339, %216 : vector<16x128xf32>
      %cst_109 = arith.constant 1.000000e+00 : f32
      %351 = vector.broadcast %cst_109 : f32 to vector<16x128xf32>
      %352 = arith.subf %16, %351 : vector<16x128xf32>
      %cst_110 = arith.constant 5.000000e+02 : f32
      %353 = vector.broadcast %cst_110 : f32 to vector<16x128xf32>
      %354 = arith.mulf %352, %353 : vector<16x128xf32>
      %cst_111 = arith.constant 1.000000e+00 : f32
      %355 = vector.broadcast %cst_111 : f32 to vector<16x128xf32>
      %356 = arith.subf %355, %354 : vector<16x128xf32>
      %357 = arith.mulf %356, %217 : vector<16x128xf32>
      %358 = arith.addf %350, %357 : vector<16x128xf32>
      %c12 = arith.constant 12 : index
      %c0_112 = arith.constant 0 : index
      %359 = vector.load %arg2[%c12, %c0_112] : memref<16x128xf32, #tpu.memory_space<vmem>>, vector<1x128xf32>
      %360 = vector.shape_cast %359 : vector<1x128xf32> to vector<128xf32>
      %361 = vector.shape_cast %360 : vector<128xf32> to vector<1x128xf32>
      %362 = vector.broadcast %361 : vector<1x128xf32> to vector<16x128xf32>
      %363 = arith.mulf %358, %362 : vector<16x128xf32>
      %364 = arith.addf %349, %363 : vector<16x128xf32>
      %365 = arith.mulf %354, %217 : vector<16x128xf32>
      %c13 = arith.constant 13 : index
      %c0_113 = arith.constant 0 : index
      %366 = vector.load %arg2[%c13, %c0_113] : memref<16x128xf32, #tpu.memory_space<vmem>>, vector<1x128xf32>
      %367 = vector.shape_cast %366 : vector<1x128xf32> to vector<128xf32>
      %368 = vector.shape_cast %367 : vector<128xf32> to vector<1x128xf32>
      %369 = vector.broadcast %368 : vector<1x128xf32> to vector<16x128xf32>
      %370 = arith.mulf %365, %369 : vector<16x128xf32>
      %371 = arith.addf %364, %370 : vector<16x128xf32>
      %372 = vector.broadcast %0 : vector<1x128xf32> to vector<16x128xf32>
      %373 = arith.addf %371, %372 : vector<16x128xf32>
      %374 = arith.index_cast %3 : i32 to index
      %c0_114 = arith.constant 0 : index
      %375 = vector.load %arg4[%374, %c0_114] : memref<64x128xf32, #tpu.memory_space<vmem>>, vector<16x128xf32>
      tpu.vector_store %arg4[%374, %c0_114], %373 {strides = array<i32>} : memref<64x128xf32, #tpu.memory_space<vmem>>, vector<16x128xf32>,
    }
    %c4_i32_1 = arith.constant 4 : i32
    return
  }
  func.func @transform_0(%arg0: i32) -> (i32, i32) {
    %c0_i32 = arith.constant 0 : i32
    %c0_i32_0 = arith.constant 0 : i32
    return %arg0, %c0_i32 : i32, i32
  }
  func.func @transform_1(%arg0: i32) -> (i32, i32) {
    %c0_i32 = arith.constant 0 : i32
    %c0_i32_0 = arith.constant 0 : i32
    %c0_i32_1 = arith.constant 0 : i32
    return %c0_i32, %c0_i32_0 : i32, i32
  }
  func.func @transform_2(%arg0: i32) -> (i32, i32) {
    %c0_i32 = arith.constant 0 : i32
    %c0_i32_0 = arith.constant 0 : i32
    %c0_i32_1 = arith.constant 0 : i32
    return %c0_i32, %c0_i32_0 : i32, i32
  }
  func.func @transform_3(%arg0: i32) -> (i32, i32) {
    %c0_i32 = arith.constant 0 : i32
    %c0_i32_0 = arith.constant 0 : i32
    return %arg0, %c0_i32 : i32, i32
  }
}

</mosaic_0001>

<bundles_post_ra>
// kernel: bspline_block.1
= control target key start
LH: loop header
LB: loop body
LE: loop exit
PB: predicated region body
PF: predicated region fallthrough
CT: control target
= control target key end

     0   :  { %s624_s14 = smov 0   ;;  %s974_s0 = inlined_call_operand.vmem [shape: f32[64,128], index: 0, kind: input, shape index: {}]   ;;  %s975_s1 = inlined_call_operand.vmem [shape: f32[16,128], index: 1, kind: input, shape index: {}]   ;;  %s976_s2 = inlined_call_operand.vmem [shape: f32[1,128], index: 2, kind: input, shape index: {}]   ;;  %s977_s3 = inlined_call_operand.vmem [shape: f32[64,128], index: 3, kind: output, shape index: {}]  }
   0x1   :  { %v622_v0 = vld [vmem:[%s976_s2] ss:$0 sm:$0xff] }
   0x2 LB: > { %s528_s15 = sshll.u32 %s595_s14, 4  ;;  %vm597_vm4 = vmmov 1   ;;  %v598_v16 = vmov 0.0   ;;  %s20_s14 = sadd.s32 1, %s595_s14   ;;  %s595_s14 = sphi %s624_s14, %s20_s14  }
   0x3   : > { %s22_s18 = scalar_lea.vmem %s974_s0, %s528_s15  ;;  %s923_s17 = scalar_lea.vmem %s977_s3, %s528_s15 }
   0x4   : > { %v23_v1 = vld [vmem:[%s22_s18] sm:$0xff]  ;;  %v635_v2 = vld [vmem:[%s22_s18 + $0x8] sm:$0xff]  ;;  %p17_p0 = scmp.ge.s32.totalorder %s20_s14, 4  }
   0x5   : > { %29 = vmax.xlane.f32.xlu1 %v23_v1  ;;  %25 = vmin.xlane.f32.xlu0 %v23_v1 }
   0x9   : > { %31 = vmax.xlane.f32.xlu1 %v635_v2  ;;  %27 = vmin.xlane.f32.xlu0 %v635_v2 }
  0x8e   : > { %v30_v3 = vpop.xlane.xlu1 %29  ;;  %v26_v4 = vpop.xlane.xlu0 %25 }
  0x8f   : > { %v33_v5 = vsub.f32 %v30_v3, %v26_v4  ;;  %v39_v6 = vsub.f32 %v23_v1, %v26_v4 }
  0x91   : > { %585 = vrcp.f32 %v33_v5 }
  0x92   : > { %v32_v7 = vpop.xlane.xlu1 %31  ;;  %v639_v8 = vpop.xlane.xlu0 %27 }
  0x93   : > { %v34_v11 = vsub.f32 %v32_v7, %v639_v8  ;;  %v40_v13 = vsub.f32 %v635_v2, %v639_v8 }
  0x95   : > { %587 = vrcp.f32 %v34_v11 }
  0x9e   : > { %v586_v9 = vpop.eup %585 }
  0x9f   : > { %v641_v10 = vmul.f32 %v586_v9, %v39_v6 }
  0xa1   : > { %vm43_vm0 = vcmp.ge.f32.partialorder %v641_v10, 0.0  ;;  %vm45_vm1 = vcmp.ge.f32.partialorder %v641_v10, 0.14285715  ;;  %vm47_vm2 = vcmp.ge.f32.partialorder %v641_v10, 0.2857143  ;;  %v125_v12 = vmul.f32 7.0, %v641_v10 }
  0xa2   : > { %vm49_vm3 = vcmp.ge.f32.partialorder %v641_v10, 0.42857143  ;;  %vm61_vm5 = vmxor %vm45_vm1, %vm597_vm4  ;;  %vm51_vm6 = vcmp.ge.f32.partialorder %v641_v10, 0.5714286  ;;  %vm53_vm7 = vcmp.ge.f32.partialorder %v641_v10, 0.71428573  ;;  %v730_v1 = vpop.eup %587 }
  0xa3   : > { %vm63_vm8 = vmand %vm43_vm0, %vm61_vm5  ;;  %vm55_vm9 = vcmp.ge.f32.partialorder %v641_v10, 0.85714287  ;;  %v661_v14 = vadd.f32 -0.14285715, %v641_v10  ;;  %v664_v15 = vadd.f32 -0.2857143, %v641_v10 }
  0xa4   : > { %vm69_vm10 = vmxor %vm47_vm2, %vm597_vm4  ;;  %vm57_vm11 = vcmp.ge.f32.partialorder %v641_v10, 1.0  ;;  %vm59_vm12 = vcmp.ge.f32.partialorder %v641_v10, 1.001  ;;  %v529_v17 = vsel %vm63_vm8, 1.0, %v598_v16  ;;  %v672_v18 = vadd.f32 -0.42857143, %v641_v10 }
  0xa5   : > { %vm71_vm13 = vmand %vm45_vm1, %vm69_vm10  ;;  %v675_v19 = vadd.f32 -0.5714286, %v641_v10  ;;  %v135_v20 = vmul.f32 7.0, %v661_v14  ;;  %v147_v21 = vmul.f32 7.0, %v664_v15  ;;  %v683_v22 = vadd.f32 -0.71428573, %v641_v10 }
  0xa6   : > { %vm77_vm14 = vmxor %vm49_vm3, %vm597_vm4  ;;  %v686_v23 = vadd.f32 -1.0, %v641_v10  ;;  %v127_v24 = vsub.f32 1.0, %v125_v12  ;;  %v159_v25 = vmul.f32 7.0, %v672_v18  ;;  %v693_v27 = vadd.f32 -0.85714287, %v641_v10 }
  0xa7   : > { %vm79_vm15 = vmand %vm47_vm2, %vm77_vm14  ;;  %v171_v26 = vmul.f32 7.0, %v675_v19  ;;  %v531_v28 = vsel %vm71_vm13, 1.0, %v598_v16  ;;  %v131_v29 = vmul.f32 %v529_v17, %v125_v12  ;;  %v137_v30 = vsub.f32 1.0, %v135_v20 }
  0xa8   : > { %vm85_vm0 = vmxor %vm51_vm6, %vm597_vm4  ;;  %v149_v31 = vsub.f32 1.0, %v147_v21  ;;  %v533_v32 = vsel %vm79_vm15, 1.0, %v598_v16  ;;  %v161_v33 = vsub.f32 1.0, %v159_v25  ;;  %v183_v35 = vmul.f32 7.0, %v683_v22 }
  0xa9   : > { %vm87_vm1 = vmand %vm49_vm3, %vm85_vm0  ;;  %v173_v34 = vsub.f32 1.0, %v171_v26  ;;  %v139_v37 = vmul.f32 %v531_v28, %v137_v30  ;;  %v195_v39 = vmul.f32 7.0, %v693_v27  ;;  %v207_v42 = vmul.f32 1000.0, %v686_v23 }
  0xaa   : > { %v535_v36 = vsel %vm87_vm1, 1.0, %v598_v16  ;;  %vm93_vm2 = vmxor %vm53_vm7, %vm597_vm4  ;;  %v151_v38 = vmul.f32 %v533_v32, %v149_v31  ;;  %v185_v41 = vsub.f32 1.0, %v183_v35  ;;  %v227_v43 = vmul.f32 3.5, %v641_v10 }
  0xab   : > { %vm95_vm5 = vmand %vm51_vm6, %vm93_vm2  ;;  %v163_v40 = vmul.f32 %v535_v36, %v161_v33  ;;  %v141_v45 = vadd.f32 %v139_v37, %v131_v29  ;;  %v143_v46 = vmul.f32 %v531_v28, %v135_v20  ;;  %v155_v47 = vmul.f32 %v533_v32, %v147_v21 }
  0xac   : > { %v537_v44 = vsel %vm95_vm5, 1.0, %v598_v16  ;;  %vm101_vm3 = vmxor %vm55_vm9, %vm597_vm4  ;;  %v129_v48 = vmul.f32 %v529_v17, %v127_v24  ;;  %v167_v49 = vmul.f32 %v535_v36, %v159_v25  ;;  %v197_v51 = vsub.f32 1.0, %v195_v39 }
  0xad   : > { %vm103_vm8 = vmand %vm53_vm7, %vm101_vm3  ;;  %v175_v50 = vmul.f32 %v537_v44, %v173_v34  ;;  %v153_v53 = vadd.f32 %v151_v38, %v143_v46  ;;  %v165_v54 = vadd.f32 %v163_v40, %v155_v47  ;;  %v559_v55 = vadd.f32 0.001, %v641_v10 }
  0xae   : > { %v539_v52 = vsel %vm103_vm8, 1.0, %v598_v16  ;;  %vm109_vm6 = vmxor %vm57_vm11, %vm597_vm4  ;;  %v209_v57 = vsub.f32 1.0, %v207_v42  ;;  %v229_v58 = vsub.f32 1.0, %v227_v43  ;;  %v237_v59 = vmul.f32 3.5, %v661_v14 }
  0xaf   : > { %vm111_vm10 = vmand %vm55_vm9, %vm109_vm6  ;;  %v187_v56 = vmul.f32 %v539_v52, %v185_v41  ;;  %v179_v61 = vmul.f32 %v537_v44, %v171_v26  ;;  %v219_v62 = vmul.f32 6.9513407, %v559_v55  ;;  %v235_v63 = vmul.f32 %v227_v43, %v141_v45 }
  0xb0   : > { %v541_v60 = vsel %vm111_vm10, 1.0, %v598_v16  ;;  %vm117_vm7 = vmxor %vm59_vm12, %vm597_vm4  ;;  %v177_v3 = vadd.f32 %v175_v50, %v167_v49  ;;  %v231_v5 = vmul.f32 %v229_v58, %v141_v45  ;;  %v247_v6 = vmul.f32 3.5, %v664_v15 }
  0xb1   : > { %vm119_vm13 = vmand %vm57_vm11, %vm117_vm7  ;;  %v199_v4 = vmul.f32 %v541_v60, %v197_v51  ;;  %v189_v9 = vadd.f32 %v187_v56, %v179_v61  ;;  %v191_v11 = vmul.f32 %v539_v52, %v183_v35  ;;  %v239_v12 = vsub.f32 1.0, %v237_v59 }
  0xb2   : > { %v543_v7 = vsel %vm119_vm13, 1.0, %v598_v16  ;;  %v203_v17 = vmul.f32 %v541_v60, %v195_v39  ;;  %v221_v21 = vsub.f32 1.0, %v219_v62  ;;  %v225_v24 = vmul.f32 %v219_v62, %v129_v48 }
  0xb3   : > { %v211_v20 = vmul.f32 %v543_v7, %v209_v57  ;;  %v201_v25 = vadd.f32 %v199_v4, %v191_v11  ;;  %v736_v26 = vmul.f32 %v543_v7, %v207_v42  ;;  %v241_v28 = vmul.f32 %v239_v12, %v153_v53 }
  0xb4   : > { %v245_v29 = vmul.f32 %v237_v59, %v153_v53  ;;  %v233_v30 = vadd.f32 %v231_v5, %v225_v24  ;;  %v249_v31 = vsub.f32 1.0, %v247_v6  ;;  %v257_v32 = vmul.f32 3.5, %v672_v18 }
  0xb5   : > { %v267_v33 = vmul.f32 3.5, %v675_v19  ;;  %v213_v34 = vadd.f32 %v211_v20, %v203_v17  ;;  %v277_v36 = vmul.f32 3.5, %v683_v22  ;;  %v287_v35 = vmul.f32 6.9513407, %v693_v27 }
  0xb6   : > { %v297_v37 = vmul.f32 666.6667, %v686_v23  ;;  %v251_v38 = vmul.f32 %v249_v31, %v165_v54  ;;  %v255_v39 = vmul.f32 %v247_v6, %v165_v54  ;;  %v259_v40 = vsub.f32 1.0, %v257_v32 }
  0xb7   : > { %v269_v41 = vsub.f32 1.0, %v267_v33  ;;  %v265_v42 = vmul.f32 %v257_v32, %v177_v3  ;;  %v275_v43 = vmul.f32 %v267_v33, %v189_v9  ;;  %v279_v44 = vsub.f32 1.0, %v277_v36 }
  0xb8   : > { %v289_v45 = vsub.f32 1.0, %v287_v35  ;;  %v261_v46 = vmul.f32 %v259_v40, %v177_v3  ;;  %v285_v49 = vmul.f32 %v277_v36, %v201_v25  ;;  %v299_v50 = vsub.f32 1.0, %v297_v37 }
  0xb9   : > { %v271_v47 = vmul.f32 %v269_v41, %v189_v9  ;;  %v281_v51 = vmul.f32 %v279_v44, %v201_v25  ;;  %v295_v53 = vmul.f32 %v287_v35, %v213_v34  ;;  %v561_v56 = vadd.f32 0.0015, %v641_v10 }
  0xba   : > { %v291_v52 = vmul.f32 %v289_v45, %v213_v34  ;;  %v223_v57 = vmul.f32 %v221_v21, %v129_v48  ;;  %v243_v58 = vadd.f32 %v241_v28, %v235_v63  ;;  %v253_v59 = vadd.f32 %v251_v38, %v245_v29 }
  0xbb   : > { %v324_v60 = vmul.f32 3.4877927, %v559_v55  ;;  %v263_v54 = vadd.f32 %v261_v46, %v255_v39  ;;  %v301_v61 = vmul.f32 %v299_v50, %v736_v26  ;;  %v309_v62 = vmul.f32 6.9272637, %v561_v56 }
  0xbc   : > { %v343_v4 = vmul.f32 2.3333333, %v641_v10  ;;  %v273_v5 = vadd.f32 %v271_v47, %v265_v42  ;;  %v283_v3 = vadd.f32 %v281_v51, %v275_v43  ;;  %v362_v7 = vmul.f32 2.3333333, %v661_v14  ;;  %v761_v42 = vld [vmem:[%s975_s1 + $0x4] ss:$0 sm:$0xff] }
  0xbd   : > { %v326_v6 = vsub.f32 1.0, %v324_v60  ;;  %v293_v9 = vadd.f32 %v291_v52, %v285_v49  ;;  %v303_v11 = vadd.f32 %v301_v61, %v295_v53  ;;  %v311_v12 = vsub.f32 1.0, %v309_v62 }
  0xbe   : > { %v341_v17 = vmul.f32 %v324_v60, %v233_v30  ;;  %v322_v20 = vmul.f32 %v309_v62, %v223_v57  ;;  %v345_v63 = vsub.f32 1.0, %v343_v4  ;;  %v381_v55 = vmul.f32 2.3333333, %v664_v15  ;;  %v754_v15 = vld [vmem:[%s975_s1 + $0x3] ss:$0 sm:$0xff] }
  0xbf   : > { %v328_v48 = vmul.f32 %v326_v6, %v233_v30  ;;  %v360_v21 = vmul.f32 %v343_v4, %v243_v58  ;;  %v364_v24 = vsub.f32 1.0, %v362_v7  ;;  %v400_v25 = vmul.f32 2.3333333, %v672_v18  ;;  %v784_v60 = vld [vmem:[%s975_s1 + $0x8] ss:$0 sm:$0xff] }
  0xc0   : > { %v419_v10 = vmul.f32 2.3333333, %v675_v19  ;;  %v313_v28 = vmul.f32 %v311_v12, %v223_v57  ;;  %v347_v29 = vmul.f32 %v345_v63, %v243_v58  ;;  %v379_v31 = vmul.f32 %v362_v7, %v253_v59  ;;  %v790_v6 = vld [vmem:[%s975_s1 + $0x9] ss:$0 sm:$0xff]  ;;  %v795_v7 = vld [vmem:[%s975_s1 + $0xa] ss:$0 sm:$0xff] }
  0xc1   : > { %v383_v32 = vsub.f32 1.0, %v381_v55  ;;  %v330_v14 = vadd.f32 %v328_v48, %v322_v20  ;;  %v366_v33 = vmul.f32 %v364_v24, %v253_v59  ;;  %v402_v34 = vsub.f32 1.0, %v400_v25  ;;  %v779_v59 = vld [vmem:[%s975_s1 + $0x7] ss:$0 sm:$0xff]  ;;  %v814_v63 = vld [vmem:[%s975_s1 + $0xb] ss:$0 sm:$0xff] }
  0xc2   : > { %v421_v36 = vsub.f32 1.0, %v419_v10  ;;  %v398_v38 = vmul.f32 %v381_v55, %v263_v54  ;;  %v417_v30 = vmul.f32 %v400_v25, %v273_v5  ;;  %v438_v39 = vmul.f32 3.4877927, %v683_v22 }
  0xc3   : > { %v385_v35 = vmul.f32 %v383_v32, %v263_v54  ;;  %v404_v18 = vmul.f32 %v402_v34, %v273_v5  ;;  %v457_v40 = vmul.f32 6.9272637, %v693_v27  ;;  %v476_v41 = vmul.f32 500.0, %v686_v23  ;;  %v767_v27 = vld [vmem:[%s975_s1 + $0x5] ss:$0 sm:$0xff] }
  0xc4   : > { %v423_v19 = vmul.f32 %v421_v36, %v283_v3  ;;  %v305_v43 = vmul.f32 %v297_v37, %v736_v26  ;;  %v349_v44 = vadd.f32 %v347_v29, %v341_v17  ;;  %v436_v22 = vmul.f32 %v419_v10, %v283_v3  ;;  %v774_v26 = vld [vmem:[%s975_s1 + $0x6] ss:$0 sm:$0xff] }
  0xc5   : > { %v440_v45 = vsub.f32 1.0, %v438_v39  ;;  %v368_v46 = vadd.f32 %v366_v33, %v360_v21  ;;  %v387_v47 = vadd.f32 %v385_v35, %v379_v31  ;;  %v455_v49 = vmul.f32 %v438_v39, %v293_v9 }
  0xc6   : > { %v459_v50 = vsub.f32 1.0, %v457_v40  ;;  %v406_v23 = vadd.f32 %v404_v18, %v398_v38  ;;  %v320_v52 = vmul.f32 %v754_v15, %v313_v28  ;;  %v337_v53 = vmul.f32 %v761_v42, %v330_v14 }
  0xc7   : > { %v442_v51 = vmul.f32 %v440_v45, %v293_v9  ;;  %v425_v37 = vadd.f32 %v423_v19, %v417_v30  ;;  %v474_v57 = vmul.f32 %v457_v40, %v303_v11  ;;  %v478_v58 = vsub.f32 1.0, %v476_v41  ;;  %v800_v9 = vld [vmem:[%s975_s1 + $0xd] ss:$0 sm:$0xff] }
  0xc8   : > { %v461_v56 = vmul.f32 %v459_v50, %v303_v11  ;;  %v493_v61 = vmul.f32 %v476_v41, %v305_v43  ;;  %v339_v62 = vadd.f32 %v337_v53, %v320_v52  ;;  %v356_v4 = vmul.f32 %v767_v27, %v349_v44 }
  0xc9   : > { %v444_v54 = vadd.f32 %v442_v51, %v436_v22  ;;  %v480_v3 = vmul.f32 %v478_v58, %v305_v43  ;;  %v806_v11 = vmul.f32 %v730_v1, %v40_v13  ;;  %v375_v17 = vmul.f32 %v774_v26, %v368_v46  ;;  %v824_v1 = vld [vmem:[%s975_s1 + $0xc] ss:$0 sm:$0xff] }
  0xca   : > { %v463_v5 = vadd.f32 %v461_v56, %v455_v49  ;;  %v358_v12 = vadd.f32 %v356_v4, %v339_v62  ;;  %v394_v20 = vmul.f32 %v779_v59, %v387_v47  ;;  %v413_v48 = vmul.f32 %v784_v60, %v406_v23 }
  0xcb   : > { %v482_v55 = vadd.f32 %v480_v3, %v474_v57  ;;  %vm44_vm9 = vcmp.ge.f32.partialorder %v806_v11, 0.0  ;;  %vm46_vm11 = vcmp.ge.f32.partialorder %v806_v11, 0.14285715  ;;  %vm48_vm12 = vcmp.ge.f32.partialorder %v806_v11, 0.2857143 }
  0xcc   : > { %v377_v2 = vadd.f32 %v375_v17, %v358_v12  ;;  %v432_v8 = vmul.f32 %v790_v6, %v425_v37  ;;  %v451_v13 = vmul.f32 %v795_v7, %v444_v54  ;;  %v827_v21 = vmul.f32 %v800_v9, %v493_v61  ;;  %vm62_vm14 = vmxor %vm46_vm11, %vm597_vm4 }
  0xcd   : > { %v470_v24 = vmul.f32 %v814_v63, %v463_v5  ;;  %vm50_vm15 = vcmp.ge.f32.partialorder %v806_v11, 0.42857143  ;;  %vm52_vm0 = vcmp.ge.f32.partialorder %v806_v11, 0.5714286  ;;  %vm54_vm1 = vcmp.ge.f32.partialorder %v806_v11, 0.71428573  ;;  %vm836_vm2 = vmand %vm44_vm9, %vm62_vm14 }
  0xce   : > { %v396_v10 = vadd.f32 %v394_v20, %v377_v2  ;;  %vm56_vm5 = vcmp.ge.f32.partialorder %v806_v11, 0.85714287  ;;  %vm70_vm3 = vmxor %vm48_vm12, %vm597_vm4  ;;  %v126_v28 = vmul.f32 7.0, %v806_v11  ;;  %v846_v29 = vadd.f32 -0.14285715, %v806_v11 }
  0xcf   : > { %v489_v31 = vmul.f32 %v824_v1, %v482_v55  ;;  %vm58_vm8 = vcmp.ge.f32.partialorder %v806_v11, 1.0  ;;  %vm72_vm6 = vmand %vm46_vm11, %vm70_vm3  ;;  %v853_v32 = vadd.f32 -0.2857143, %v806_v11  ;;  %v856_v14 = vadd.f32 -0.42857143, %v806_v11 }
  0xd0   : > { %v415_v33 = vadd.f32 %v413_v48, %v396_v10  ;;  %vm60_vm10 = vcmp.ge.f32.partialorder %v806_v11, 1.001  ;;  %vm78_vm7 = vmxor %vm50_vm15, %vm597_vm4  ;;  %v136_v34 = vmul.f32 7.0, %v846_v29  ;;  %v864_v36 = vadd.f32 -0.5714286, %v806_v11 }
  0xd1   : > { %v530_v35 = vsel %vm836_vm2, 1.0, %v598_v16  ;;  %vm80_vm13 = vmand %vm48_vm12, %vm78_vm7  ;;  %v148_v38 = vmul.f32 7.0, %v853_v32  ;;  %v160_v30 = vmul.f32 7.0, %v856_v14  ;;  %v874_v39 = vadd.f32 -0.71428573, %v806_v11 }
  0xd2   : > { %v434_v18 = vadd.f32 %v432_v8, %v415_v33  ;;  %v532_v19 = vsel %vm72_vm6, 1.0, %v598_v16  ;;  %vm86_vm9 = vmxor %vm52_vm0, %vm597_vm4  ;;  %v128_v40 = vsub.f32 1.0, %v126_v28  ;;  %v138_v41 = vsub.f32 1.0, %v136_v34 }
  0xd3   : > { %v534_v43 = vsel %vm80_vm13, 1.0, %v598_v16  ;;  %vm88_vm11 = vmand %vm50_vm15, %vm86_vm9  ;;  %v150_v44 = vsub.f32 1.0, %v148_v38  ;;  %v162_v22 = vsub.f32 1.0, %v160_v30  ;;  %v172_v45 = vmul.f32 7.0, %v864_v36 }
  0xd4   : > { %v453_v46 = vadd.f32 %v451_v13, %v434_v18  ;;  %v536_v47 = vsel %vm88_vm11, 1.0, %v598_v16  ;;  %vm94_vm12 = vmxor %vm54_vm1, %vm597_vm4  ;;  %v140_v49 = vmul.f32 %v532_v19, %v138_v41  ;;  %v184_v50 = vmul.f32 7.0, %v874_v39 }
  0xd5   : > { %vm96_vm14 = vmand %vm52_vm0, %vm94_vm12  ;;  %v132_v23 = vmul.f32 %v530_v35, %v126_v28  ;;  %v152_v51 = vmul.f32 %v534_v43, %v150_v44  ;;  %v164_v52 = vmul.f32 %v536_v47, %v162_v22  ;;  %v174_v53 = vsub.f32 1.0, %v172_v45 }
  0xd6   : > { %v472_v37 = vadd.f32 %v470_v24, %v453_v46  ;;  %vm102_vm15 = vmxor %vm56_vm5, %vm597_vm4  ;;  %v130_v56 = vmul.f32 %v530_v35, %v128_v40  ;;  %v144_v57 = vmul.f32 %v532_v19, %v136_v34  ;;  %v186_v58 = vsub.f32 1.0, %v184_v50 }
  0xd7   : > { %v538_v54 = vsel %vm96_vm14, 1.0, %v598_v16  ;;  %vm104_vm2 = vmand %vm54_vm1, %vm102_vm15  ;;  %v142_v61 = vadd.f32 %v140_v49, %v132_v23  ;;  %v156_v62 = vmul.f32 %v534_v43, %v148_v38  ;;  %v168_v4 = vmul.f32 %v536_v47, %v160_v30 }
  0xd8   : > { %v491_v5 = vadd.f32 %v489_v31, %v472_v37  ;;  %vm110_vm0 = vmxor %vm58_vm8, %vm597_vm4  ;;  %v154_v3 = vadd.f32 %v152_v51, %v144_v57  ;;  %v901_v12 = vadd.f32 -0.85714287, %v806_v11  ;;  %v904_v17 = vadd.f32 -1.0, %v806_v11 }
  0xd9   : > { %v540_v20 = vsel %vm104_vm2, 1.0, %v598_v16  ;;  %vm112_vm1 = vmand %vm56_vm5, %vm110_vm0  ;;  %v166_v48 = vadd.f32 %v164_v52, %v156_v62  ;;  %v176_v55 = vmul.f32 %v538_v54, %v174_v53  ;;  %v910_v2 = vadd.f32 0.001, %v806_v11 }
  0xda   : > { %v502_v8 = vadd.f32 %v827_v21, %v491_v5  ;;  %vm118_vm3 = vmxor %vm60_vm10, %vm597_vm4  ;;  %v188_v13 = vmul.f32 %v540_v20, %v186_v58  ;;  %v196_v24 = vmul.f32 7.0, %v901_v12  ;;  %v208_v25 = vmul.f32 1000.0, %v904_v17 }
  0xdb   : > { %v542_v10 = vsel %vm112_vm1, 1.0, %v598_v16  ;;  %vm120_vm5 = vmand %vm58_vm8, %vm118_vm3  ;;  %v180_v21 = vmul.f32 %v538_v54, %v172_v45  ;;  %v220_v28 = vmul.f32 6.9513407, %v910_v2  ;;  %v228_v31 = vmul.f32 3.5, %v806_v11 }
  0xdc   : > { %v510_v33 = vadd.f32 %v622_v0, %v502_v8  ;;  %v544_v34 = vsel %vm120_vm5, 1.0, %v598_v16  ;;  %v198_v35 = vsub.f32 1.0, %v196_v24  ;;  %v238_v38 = vmul.f32 3.5, %v846_v29 }
  0xdd   : > { %v178_v30 = vadd.f32 %v176_v55, %v168_v4  ;;  %v192_v18 = vmul.f32 %v540_v20, %v184_v50  ;;  %v210_v19 = vsub.f32 1.0, %v208_v25  ;;  %v222_v40 = vsub.f32 1.0, %v220_v28 }
  0xde   : > { %513 = vst [vmem:[%s923_s17] sm:$0xff] %v510_v33  ;;  %v190_v41 = vadd.f32 %v188_v13, %v180_v21  ;;  %v200_v43 = vmul.f32 %v542_v10, %v198_v35  ;;  %v204_v44 = vmul.f32 %v542_v10, %v196_v24  ;;  %v934_v22 = vmul.f32 %v544_v34, %v208_v25 }
  0xdf   : > { %v212_v45 = vmul.f32 %v544_v34, %v210_v19  ;;  %v226_v46 = vmul.f32 %v220_v28, %v130_v56  ;;  %v230_v47 = vsub.f32 1.0, %v228_v31  ;;  %v248_v49 = vmul.f32 3.5, %v853_v32 }
  0xe0   : > { %v224_v23 = vmul.f32 %v222_v40, %v130_v56  ;;  %v236_v16 = vmul.f32 %v228_v31, %v142_v61  ;;  %v240_v51 = vsub.f32 1.0, %v238_v38  ;;  %v258_v52 = vmul.f32 3.5, %v856_v14 }
  0xe1   : > { %v232_v53 = vmul.f32 %v230_v47, %v142_v61  ;;  %v246_v50 = vmul.f32 %v238_v38, %v154_v3  ;;  %v250_v37 = vsub.f32 1.0, %v248_v49  ;;  %v268_v57 = vmul.f32 3.5, %v864_v36 }
  0xe2   : > { %v202_v58 = vadd.f32 %v200_v43, %v192_v18  ;;  %v214_v54 = vadd.f32 %v212_v45, %v204_v44  ;;  %v242_v62 = vmul.f32 %v240_v51, %v154_v3  ;;  %v260_v4 = vsub.f32 1.0, %v258_v52 }
  0xe3   : > { %v252_v5 = vmul.f32 %v250_v37, %v166_v48  ;;  %v256_v20 = vmul.f32 %v248_v49, %v166_v48  ;;  %v270_v55 = vsub.f32 1.0, %v268_v57  ;;  %v278_v8 = vmul.f32 3.5, %v874_v39 }
  0xe4   : > { %v262_v13 = vmul.f32 %v260_v4, %v178_v30  ;;  %v288_v56 = vmul.f32 6.9513407, %v901_v12  ;;  %v942_v24 = vmul.f32 666.6667, %v904_v17  ;;  %v562_v61 = vadd.f32 0.0015, %v806_v11 }
  0xe5   : > { %v234_v25 = vadd.f32 %v232_v53, %v226_v46  ;;  %v266_v10 = vmul.f32 %v258_v52, %v178_v30  ;;  %v272_v21 = vmul.f32 %v270_v55, %v190_v41  ;;  %v280_v28 = vsub.f32 1.0, %v278_v8 }
  0xe6   : > { %v244_v31 = vadd.f32 %v242_v62, %v236_v16  ;;  %v254_v3 = vadd.f32 %v252_v5, %v246_v50  ;;  %v276_v33 = vmul.f32 %v268_v57, %v190_v41  ;;  %v300_v48 = vsub.f32 1.0, %v942_v24 }
  0xe7   : > { %v282_v34 = vmul.f32 %v280_v28, %v202_v58  ;;  %v286_v35 = vmul.f32 %v278_v8, %v202_v58  ;;  %v290_v38 = vsub.f32 1.0, %v288_v56  ;;  %v310_v18 = vmul.f32 6.9272637, %v562_v61 }
  0xe8   : > { %v264_v19 = vadd.f32 %v262_v13, %v256_v20  ;;  %v296_v40 = vmul.f32 %v288_v56, %v214_v54  ;;  %v325_v43 = vmul.f32 3.4877927, %v910_v2  ;;  %v344_v44 = vmul.f32 2.3333333, %v806_v11 }
  0xe9   : > { %v274_v45 = vadd.f32 %v272_v21, %v266_v10  ;;  %v292_v46 = vmul.f32 %v290_v38, %v214_v54  ;;  %v312_v30 = vsub.f32 1.0, %v310_v18  ;;  %v363_v47 = vmul.f32 2.3333333, %v846_v29 }
  0xea   : > { %v284_v49 = vadd.f32 %v282_v34, %v276_v33  ;;  %v302_v41 = vmul.f32 %v300_v48, %v934_v22  ;;  %v323_v16 = vmul.f32 %v310_v18, %v224_v23  ;;  %v327_v51 = vsub.f32 1.0, %v325_v43 }
  0xeb   : > { %v314_v52 = vmul.f32 %v312_v30, %v224_v23  ;;  %v342_v53 = vmul.f32 %v325_v43, %v234_v25  ;;  %v346_v50 = vsub.f32 1.0, %v344_v44  ;;  %v365_v37 = vsub.f32 1.0, %v363_v47 }
  0xec   : > { %v329_v57 = vmul.f32 %v327_v51, %v234_v25  ;;  %v361_v58 = vmul.f32 %v344_v44, %v244_v31  ;;  %v382_v2 = vmul.f32 2.3333333, %v853_v32  ;;  %v401_v11 = vmul.f32 2.3333333, %v856_v14 }
  0xed   : > { %v294_v62 = vadd.f32 %v292_v46, %v286_v35  ;;  %v348_v54 = vmul.f32 %v346_v50, %v244_v31  ;;  %v367_v4 = vmul.f32 %v365_v37, %v254_v3  ;;  %v420_v29 = vmul.f32 2.3333333, %v864_v36 }
  0xee   : > { %v331_v5 = vadd.f32 %v329_v57, %v323_v16  ;;  %v380_v20 = vmul.f32 %v363_v47, %v254_v3  ;;  %v384_v55 = vsub.f32 1.0, %v382_v2  ;;  %v403_v8 = vsub.f32 1.0, %v401_v11 }
  0xef   : > { %v321_v23 = vmul.f32 %v754_v15, %v314_v52  ;;  %v350_v13 = vadd.f32 %v348_v54, %v342_v53  ;;  %v399_v56 = vmul.f32 %v382_v2, %v264_v19  ;;  %v422_v61 = vsub.f32 1.0, %v420_v29 }
  0xf0   : > { %v338_v25 = vmul.f32 %v761_v42, %v331_v5  ;;  %v369_v10 = vadd.f32 %v367_v4, %v361_v58  ;;  %v386_v32 = vmul.f32 %v384_v55, %v264_v19  ;;  %v405_v21 = vmul.f32 %v403_v8, %v274_v45 }
  0xf1   : > { %v304_v14 = vadd.f32 %v302_v41, %v296_v40  ;;  %v418_v28 = vmul.f32 %v401_v11, %v274_v45  ;;  %v424_v31 = vmul.f32 %v422_v61, %v284_v49  ;;  %v439_v33 = vmul.f32 3.4877927, %v874_v39 }
  0xf2   : > { %v340_v36 = vadd.f32 %v338_v25, %v321_v23  ;;  %v357_v3 = vmul.f32 %v767_v27, %v350_v13  ;;  %v388_v48 = vadd.f32 %v386_v32, %v380_v20  ;;  %v458_v34 = vmul.f32 6.9272637, %v901_v12 }
  0xf3   : > { %v407_v15 = vadd.f32 %v405_v21, %v399_v56  ;;  %v437_v35 = vmul.f32 %v420_v29, %v284_v49  ;;  %v441_v38 = vsub.f32 1.0, %v439_v33  ;;  %v376_v42 = vmul.f32 %v774_v26, %v369_v10 }
  0xf4   : > { %v359_v18 = vadd.f32 %v357_v3, %v340_v36  ;;  %v460_v43 = vsub.f32 1.0, %v458_v34  ;;  %v477_v19 = vmul.f32 500.0, %v904_v17  ;;  %v306_v40 = vmul.f32 %v942_v24, %v934_v22 }
  0xf5   : > { %v426_v44 = vadd.f32 %v424_v31, %v418_v28  ;;  %v443_v39 = vmul.f32 %v441_v38, %v294_v62  ;;  %v395_v27 = vmul.f32 %v779_v59, %v388_v48  ;;  %v456_v46 = vmul.f32 %v439_v33, %v294_v62 }
  0xf6   : > { %v378_v45 = vadd.f32 %v376_v42, %v359_v18  ;;  %v462_v30 = vmul.f32 %v460_v43, %v304_v14  ;;  %v414_v12 = vmul.f32 %v784_v60, %v407_v15  ;;  %v475_v41 = vmul.f32 %v458_v34, %v304_v14 }
  0xf7   : > { %v445_v49 = vadd.f32 %v443_v39, %v437_v35  ;;  %v479_v16 = vsub.f32 1.0, %v477_v19  ;;  %v433_v17 = vmul.f32 %v790_v6, %v426_v44  ;;  %v494_v37 = vmul.f32 %v477_v19, %v306_v40 }
  0xf8   : > { %v397_v47 = vadd.f32 %v395_v27, %v378_v45  ;;  %v464_v51 = vadd.f32 %v462_v30, %v456_v46 }
  0xf9   : > { %v481_v52 = vmul.f32 %v479_v16, %v306_v40  ;;  %v452_v24 = vmul.f32 %v795_v7, %v445_v49  ;;  %v501_v2 = vmul.f32 %v800_v9, %v494_v37 }
  0xfa   : > { %v416_v26 = vadd.f32 %v414_v12, %v397_v47  ;;  %v471_v59 = vmul.f32 %v814_v63, %v464_v51 }
  0xfb   : > { %v483_v53 = vadd.f32 %v481_v52, %v475_v41 }
  0xfc   : > { %v435_v22 = vadd.f32 %v433_v17, %v416_v26 }
  0xfd   : > { %v490_v60 = vmul.f32 %v824_v1, %v483_v53 }
  0xfe   : > { %v454_v50 = vadd.f32 %v452_v24, %v435_v22 }
 0x100   : > { %v473_v57 = vadd.f32 %v471_v59, %v454_v50 }
 0x102   : > { %v492_v58 = vadd.f32 %v490_v60, %v473_v57 }
 0x104   : > { %v503_v11 = vadd.f32 %v501_v2, %v492_v58  ;;  %19 = sbr.rel (!%p17_p0) target bundleno = 2 (0x2), region = 41 }
 0x106   : > { %v511_v62 = vadd.f32 %v622_v0, %v503_v11 }
 0x108   : > { %514 = vst [vmem:[%s923_s17 + $0x8] sm:$0xff] %v511_v62 }

</bundles_post_ra>
